<compile_context>
chip_gen: v6e
topology: v6e:2x2x1
jax: 0.10.0
libtpu: 0.0.40
codegen_flags: <defaults>
</compile_context>

<pallas_src>
import math

import jax
import jax.numpy as jnp
from jax.experimental import pallas as pl
from jax.experimental.pallas import tpu as pltpu

# Model hyper-parameters (small, consistent with the module's __init__ signature)
D_MODEL = 32
NUM_HEADS = 4
D_FF = 64
D_K = D_MODEL // NUM_HEADS
EPS = 1e-5          # nn.LayerNorm default
NEG_INF = -1e9      # mirrors scores.masked_fill(mask == 0, -1e9)

# ---- packed parameter-slab layout (rows x 128 lanes), built once at init -------------
_R_WQKV = 0                       # rows [  0, 32) cols [0,96)  : [Wq*scale | Wk | Wv]
_R_WO = D_MODEL                   # rows [ 32, 64) cols [0,32)  : Wo
#                                   rows [ 32, 64) cols [32,96) : W1
_R_W2 = 2 * D_MODEL               # rows [ 64,128) cols [0,32)  : W2
_R_VEC = 2 * D_MODEL + D_FF       # rows [128,136): bqkv, bo, b1, b2, g1, be1, g2, be2
SLAB_ROWS = _R_VEC + 8            # 136 (multiple of 8)
SLAB_LANES = 128


def _layernorm(v, gamma, beta):
    mu = jnp.mean(v, axis=-1, keepdims=True)
    var = jnp.mean((v - mu) ** 2, axis=-1, keepdims=True)  # biased var, like torch
    return (v - mu) * jax.lax.rsqrt(var + EPS) * gamma + beta


def encoder_layer_kernel(x_ref, mask_ref, w_ref, o_ref):
    x = x_ref[...]                                   # (B*S, D)  whole (flattened) batch
    bs = x.shape[0]
    b, s, _ = mask_ref.shape

    # ---- static, lane-dense slices of the single packed parameter slab ---------------
    wqkv = w_ref[_R_WQKV:_R_WQKV + D_MODEL, 0:3 * D_MODEL]        # (32, 96)
    wo = w_ref[_R_WO:_R_WO + D_MODEL, 0:D_MODEL]                  # (32, 32)
    w1 = w_ref[_R_WO:_R_WO + D_MODEL, D_MODEL:D_MODEL + D_FF]     # (32, 64)
    w2 = w_ref[_R_W2:_R_W2 + D_FF, 0:D_MODEL]                     # (64, 32)
    bqkv = w_ref[_R_VEC + 0:_R_VEC + 1, 0:3 * D_MODEL]            # (1, 96)
    bo = w_ref[_R_VEC + 1:_R_VEC + 2, 0:D_MODEL]
    b1 = w_ref[_R_VEC + 2:_R_VEC + 3, 0:D_FF]
    b2 = w_ref[_R_VEC + 3:_R_VEC + 4, 0:D_MODEL]
    g1 = w_ref[_R_VEC + 4:_R_VEC + 5, 0:D_MODEL]
    be1 = w_ref[_R_VEC + 5:_R_VEC + 6, 0:D_MODEL]
    g2 = w_ref[_R_VEC + 6:_R_VEC + 7, 0:D_MODEL]
    be2 = w_ref[_R_VEC + 7:_R_VEC + 8, 0:D_MODEL]

    # ---- fused QKV projection: ONE (BS,32)@(32,96) MXU matmul (1/sqrt(dk) pre-folded) -
    qkv = jnp.dot(x, wqkv, preferred_element_type=jnp.float32) + bqkv    # (BS, 96)

    # split heads/batch into the leading batched-matmul axis: g = head * B + batch
    def split_heads(col0):
        return jnp.concatenate(
            [qkv[:, col0 + h * D_K:col0 + (h + 1) * D_K].reshape(b, s, D_K)
             for h in range(NUM_HEADS)], axis=0)                         # (H*B, S, DK)

    q = split_heads(0)
    k = split_heads(D_MODEL)
    v = split_heads(2 * D_MODEL)

    # additive mask bias built in-kernel from the tiny (B,S,S) mask (no (BS,BS) input)
    mbias = jnp.where(mask_ref[...] == 0.0, NEG_INF, 0.0)                # (B, S, S)
    mbias = jnp.concatenate([mbias] * NUM_HEADS, axis=0)                 # (H*B, S, S)

    # ---- attention: batched over (head, batch) ----------------------------------------
    scores = jnp.einsum('gqe,gke->gqk', q, k,
                        preferred_element_type=jnp.float32) + mbias
    scores = scores - jnp.max(scores, axis=-1, keepdims=True)            # stable softmax
    p = jnp.exp(scores)
    p = p * pl.reciprocal(jnp.sum(p, axis=-1, keepdims=True), approx=True)
    ctx = jnp.einsum('gqk,gke->gqe', p, v,
                     preferred_element_type=jnp.float32)                 # (H*B, S, DK)

    # concat heads back to (BS, D) (columns head-major) -> ONE output-projection matmul
    ctx2 = jnp.concatenate(
        [ctx[h * b:(h + 1) * b].reshape(bs, D_K) for h in range(NUM_HEADS)], axis=-1)
    attn = jnp.dot(ctx2, wo, preferred_element_type=jnp.float32) + bo    # (BS, 32)

    # dropout -> identity (eval mode)
    # TODO(synk): training-mode dropout mask not implemented (eval semantics only).
    y = _layernorm(x + attn, g1, be1)

    # ---- position-wise feed forward ----------------------------------------------------
    h1 = jnp.maximum(
        jnp.dot(y, w1, preferred_element_type=jnp.float32) + b1, 0.0)
    ff = jnp.dot(h1, w2, preferred_element_type=jnp.float32) + b2

    o_ref[...] = _layernorm(y + ff, g2, be2).astype(o_ref.dtype)


def pack_encoder_params(params):
    """Build the single lane-dense (136, 128) f32 parameter slab.  Call ONCE at init."""
    (wq, bq, wk, bk, wv, bv, wo, bo, w1, b1, w2, b2, g1, be1, g2, be2) = params
    f32 = jnp.float32
    scale = 1.0 / math.sqrt(D_K)                       # folded into the Q columns
    wqkv = jnp.concatenate([wq * scale, wk, wv], axis=1).astype(f32)     # (32, 96)
    bqkv = jnp.concatenate([bq * scale, bk, bv], axis=1).astype(f32)     # (1, 96)

    slab = jnp.zeros((SLAB_ROWS, SLAB_LANES), f32)
    slab = slab.at[_R_WQKV:_R_WQKV + D_MODEL, 0:3 * D_MODEL].set(wqkv)
    slab = slab.at[_R_WO:_R_WO + D_MODEL, 0:D_MODEL].set(wo.astype(f32))
    slab = slab.at[_R_WO:_R_WO + D_MODEL, D_MODEL:D_MODEL + D_FF].set(w1.astype(f32))
    slab = slab.at[_R_W2:_R_W2 + D_FF, 0:D_MODEL].set(w2.astype(f32))
    vecs = [bqkv, bo.astype(f32), b1.astype(f32), b2.astype(f32),
            g1.astype(f32), be1.astype(f32), g2.astype(f32), be2.astype(f32)]
    for i, vec in enumerate(vecs):
        slab = slab.at[_R_VEC + i:_R_VEC + i + 1, 0:vec.shape[1]].set(vec)
    return slab


@jax.jit
def encoder_layer(x, mask, slab):
    """x: (B, S, D_MODEL), mask: (B, S, S) {0,1}, slab: pre-packed parameter slab."""
    B, S, D = x.shape
    assert D == D_MODEL
    BS = B * S
    x2d = x.reshape(BS, D_MODEL).astype(jnp.float32)
    mask3 = mask.astype(jnp.float32)

    def full(shape):
        return pl.BlockSpec(shape, lambda i, n=len(shape): (0,) * n)

    out = pl.pallas_call(
        encoder_layer_kernel,
        out_shape=jax.ShapeDtypeStruct((BS, D_MODEL), jnp.float32),
        grid_spec=pltpu.PrefetchScalarGridSpec(
            num_scalar_prefetch=0,
            grid=(1,),                        # whole (tiny) problem in one invocation
            in_specs=[full((BS, D_MODEL)),
                      full((B, S, S)),
                      full((SLAB_ROWS, SLAB_LANES))],
            out_specs=full((BS, D_MODEL)),
        ),
        compiler_params=pltpu.CompilerParams(
            dimension_semantics=("arbitrary",)),
    )(x2d, mask3, slab)
    return out.reshape(B, S, D_MODEL)


def reference(x, mask, params):
    (wq, bq, wk, bk, wv, bv, wo, bo, w1, b1, w2, b2, g1, be1, g2, be2) = params
    B, S, D = x.shape

    def ln(v, g, b):
        mu = jnp.mean(v, axis=-1, keepdims=True)
        var = jnp.mean((v - mu) ** 2, axis=-1, keepdims=True)
        return (v - mu) / jnp.sqrt(var + EPS) * g + b

    q = x @ wq + bq
    k = x @ wk + bk
    v = x @ wv + bv
    q = q.reshape(B, S, NUM_HEADS, D_K).transpose(0, 2, 1, 3)
    k = k.reshape(B, S, NUM_HEADS, D_K).transpose(0, 2, 1, 3)
    v = v.reshape(B, S, NUM_HEADS, D_K).transpose(0, 2, 1, 3)
    scores = jnp.einsum("bhqd,bhkd->bhqk", q, k) / math.sqrt(D_K)
    scores = jnp.where(mask[:, None, :, :] == 0.0, NEG_INF, scores)
    p = jax.nn.softmax(scores, axis=-1)
    attn = jnp.einsum("bhqk,bhkd->bhqd", p, v).transpose(0, 2, 1, 3).reshape(B, S, D)
    attn = attn @ wo + bo
    y = ln(x + attn, g1, be1)
    ff = jnp.maximum(y @ w1 + b1, 0.0) @ w2 + b2
    return ln(y + ff, g2, be2)


def make_params(key):
    ks = jax.random.split(key, 8)
    scale = 0.02
    wq = scale * jax.random.normal(ks[0], (D_MODEL, D_MODEL), jnp.float32)
    wk = scale * jax.random.normal(ks[1], (D_MODEL, D_MODEL), jnp.float32)
    wv = scale * jax.random.normal(ks[2], (D_MODEL, D_MODEL), jnp.float32)
    wo = scale * jax.random.normal(ks[3], (D_MODEL, D_MODEL), jnp.float32)
    w1 = scale * jax.random.normal(ks[4], (D_MODEL, D_FF), jnp.float32)
    w2 = scale * jax.random.normal(ks[5], (D_FF, D_MODEL), jnp.float32)
    bq = 0.01 * jnp.ones((1, D_MODEL), jnp.float32)
    bk = -0.01 * jnp.ones((1, D_MODEL), jnp.float32)
    bv = 0.02 * jnp.ones((1, D_MODEL), jnp.float32)
    bo = jnp.zeros((1, D_MODEL), jnp.float32)
    b1 = 0.03 * jnp.ones((1, D_FF), jnp.float32)
    b2 = jnp.zeros((1, D_MODEL), jnp.float32)
    g1 = jnp.ones((1, D_MODEL), jnp.float32)
    be1 = jnp.zeros((1, D_MODEL), jnp.float32)
    g2 = jnp.ones((1, D_MODEL), jnp.float32)
    be2 = jnp.zeros((1, D_MODEL), jnp.float32)
    return (wq, bq, wk, bk, wv, bv, wo, bo, w1, b1, w2, b2, g1, be1, g2, be2)


if __name__ == "__main__":
    B, S = 2, 8
    key = jax.random.PRNGKey(0)
    kx, kp = jax.random.split(key)
    x = jax.random.normal(kx, (B, S, D_MODEL), jnp.float32)
    params = make_params(kp)

    # key-padding style mask: batch 0 attends to all 8 positions, batch 1 to first 6
    valid_len = jnp.array([S, S - 2], jnp.int32)
    mask = (jnp.arange(S)[None, None, :] < valid_len[:, None, None]).astype(jnp.float32)
    mask = jnp.broadcast_to(mask, (B, S, S))

    # one-time parameter packing (hoisted out of the per-call path)
    slab = jax.block_until_ready(pack_encoder_params(params))

    out = jax.block_until_ready(encoder_layer(x, mask, slab))

    ref = reference(x, mask, params)
    assert out.shape == (B, S, D_MODEL)
    assert jnp.allclose(out, ref, atol=2e-3, rtol=2e-3), "mismatch vs reference"
    print("KERNEL_OK")
</pallas_src>

<mosaic_0001>
module attributes {stable_mosaic.version = 11 : i64} {
  func.func @encoder_layer_kernel(%arg0: i32, %arg1: memref<16x32xf32, #tpu.memory_space<vmem>>, %arg2: memref<2x8x8xf32, #tpu.memory_space<vmem>>, %arg3: memref<136x128xf32, #tpu.memory_space<vmem>>, %arg4: memref<16x32xf32, #tpu.memory_space<vmem>>) attributes {dimension_semantics = [#tpu.dimension_semantics<arbitrary>], iteration_bounds = array<i64: 1>, scalar_prefetch = 0 : i64, scratch_operands = 0 : i64, tpu.core_type = #tpu.core_type<tc>, window_params = [{pipeline_mode = #tpu.pipeline_mode<synchronous>, transform_indices = @transform_0, window_bounds = array<i64: 16, 32>}, {pipeline_mode = #tpu.pipeline_mode<synchronous>, transform_indices = @transform_1, window_bounds = array<i64: 2, 8, 8>}, {pipeline_mode = #tpu.pipeline_mode<synchronous>, transform_indices = @transform_2, window_bounds = array<i64: 136, 128>}, {pipeline_mode = #tpu.pipeline_mode<synchronous>, transform_indices = @transform_3, window_bounds = array<i64: 16, 32>}]} {
    %c0 = arith.constant 0 : index
    %c0_0 = arith.constant 0 : index
    %0 = vector.load %arg1[%c0, %c0_0] : memref<16x32xf32, #tpu.memory_space<vmem>>, vector<16x32xf32>
    %c0_1 = arith.constant 0 : index
    %c0_2 = arith.constant 0 : index
    %1 = vector.load %arg3[%c0_1, %c0_2] : memref<136x128xf32, #tpu.memory_space<vmem>>, vector<32x96xf32>
    %c32 = arith.constant 32 : index
    %c0_3 = arith.constant 0 : index
    %2 = vector.load %arg3[%c32, %c0_3] : memref<136x128xf32, #tpu.memory_space<vmem>>, vector<32x32xf32>
    %c32_4 = arith.constant 32 : index
    %c32_5 = arith.constant 32 : index
    %3 = vector.load %arg3[%c32_4, %c32_5] : memref<136x128xf32, #tpu.memory_space<vmem>>, vector<32x64xf32>
    %c64 = arith.constant 64 : index
    %c0_6 = arith.constant 0 : index
    %4 = vector.load %arg3[%c64, %c0_6] : memref<136x128xf32, #tpu.memory_space<vmem>>, vector<64x32xf32>
    %c128 = arith.constant 128 : index
    %c0_7 = arith.constant 0 : index
    %5 = vector.load %arg3[%c128, %c0_7] : memref<136x128xf32, #tpu.memory_space<vmem>>, vector<1x96xf32>
    %c129 = arith.constant 129 : index
    %c0_8 = arith.constant 0 : index
    %6 = vector.load %arg3[%c129, %c0_8] : memref<136x128xf32, #tpu.memory_space<vmem>>, vector<1x32xf32>
    %c130 = arith.constant 130 : index
    %c0_9 = arith.constant 0 : index
    %7 = vector.load %arg3[%c130, %c0_9] : memref<136x128xf32, #tpu.memory_space<vmem>>, vector<1x64xf32>
    %c131 = arith.constant 131 : index
    %c0_10 = arith.constant 0 : index
    %8 = vector.load %arg3[%c131, %c0_10] : memref<136x128xf32, #tpu.memory_space<vmem>>, vector<1x32xf32>
    %c132 = arith.constant 132 : index
    %c0_11 = arith.constant 0 : index
    %9 = vector.load %arg3[%c132, %c0_11] : memref<136x128xf32, #tpu.memory_space<vmem>>, vector<1x32xf32>
    %c133 = arith.constant 133 : index
    %c0_12 = arith.constant 0 : index
    %10 = vector.load %arg3[%c133, %c0_12] : memref<136x128xf32, #tpu.memory_space<vmem>>, vector<1x32xf32>
    %c134 = arith.constant 134 : index
    %c0_13 = arith.constant 0 : index
    %11 = vector.load %arg3[%c134, %c0_13] : memref<136x128xf32, #tpu.memory_space<vmem>>, vector<1x32xf32>
    %c135 = arith.constant 135 : index
    %c0_14 = arith.constant 0 : index
    %12 = vector.load %arg3[%c135, %c0_14] : memref<136x128xf32, #tpu.memory_space<vmem>>, vector<1x32xf32>
    %cst = arith.constant dense<0.000000e+00> : vector<16x96xf32>
    %13 = tpu.matmul %0, %1, %cst {dimension_numbers = #tpu.dot_dimension_numbers<[1], [0], [0], [1], [0, 0, 1, 1], [], []>} : vector<16x32xf32>, vector<32x96xf32>, vector<16x96xf32> -> vector<16x96xf32>
    %14 = vector.broadcast %5 : vector<1x96xf32> to vector<16x96xf32>
    %15 = arith.addf %13, %14 : vector<16x96xf32>
    %16 = vector.extract_strided_slice %15 {offsets = [0, 0], sizes = [16, 8], strides = [1, 1]} : vector<16x96xf32> to vector<16x8xf32>
    %17 = vector.shape_cast %16 : vector<16x8xf32> to vector<2x8x8xf32>
    %18 = vector.extract_strided_slice %15 {offsets = [0, 8], sizes = [16, 8], strides = [1, 1]} : vector<16x96xf32> to vector<16x8xf32>
    %19 = vector.shape_cast %18 : vector<16x8xf32> to vector<2x8x8xf32>
    %20 = vector.extract_strided_slice %15 {offsets = [0, 16], sizes = [16, 8], strides = [1, 1]} : vector<16x96xf32> to vector<16x8xf32>
    %21 = vector.shape_cast %20 : vector<16x8xf32> to vector<2x8x8xf32>
    %22 = vector.extract_strided_slice %15 {offsets = [0, 24], sizes = [16, 8], strides = [1, 1]} : vector<16x96xf32> to vector<16x8xf32>
    %23 = vector.shape_cast %22 : vector<16x8xf32> to vector<2x8x8xf32>
    %24 = tpu.concatenate %17, %19, %21, %23 in 0 : vector<2x8x8xf32>, vector<2x8x8xf32>, vector<2x8x8xf32>, vector<2x8x8xf32> -> vector<8x8x8xf32>
    %25 = vector.extract_strided_slice %15 {offsets = [0, 32], sizes = [16, 8], strides = [1, 1]} : vector<16x96xf32> to vector<16x8xf32>
    %26 = vector.shape_cast %25 : vector<16x8xf32> to vector<2x8x8xf32>
    %27 = vector.extract_strided_slice %15 {offsets = [0, 40], sizes = [16, 8], strides = [1, 1]} : vector<16x96xf32> to vector<16x8xf32>
    %28 = vector.shape_cast %27 : vector<16x8xf32> to vector<2x8x8xf32>
    %29 = vector.extract_strided_slice %15 {offsets = [0, 48], sizes = [16, 8], strides = [1, 1]} : vector<16x96xf32> to vector<16x8xf32>
    %30 = vector.shape_cast %29 : vector<16x8xf32> to vector<2x8x8xf32>
    %31 = vector.extract_strided_slice %15 {offsets = [0, 56], sizes = [16, 8], strides = [1, 1]} : vector<16x96xf32> to vector<16x8xf32>
    %32 = vector.shape_cast %31 : vector<16x8xf32> to vector<2x8x8xf32>
    %33 = tpu.concatenate %26, %28, %30, %32 in 0 : vector<2x8x8xf32>, vector<2x8x8xf32>, vector<2x8x8xf32>, vector<2x8x8xf32> -> vector<8x8x8xf32>
    %34 = vector.extract_strided_slice %15 {offsets = [0, 64], sizes = [16, 8], strides = [1, 1]} : vector<16x96xf32> to vector<16x8xf32>
    %35 = vector.shape_cast %34 : vector<16x8xf32> to vector<2x8x8xf32>
    %36 = vector.extract_strided_slice %15 {offsets = [0, 72], sizes = [16, 8], strides = [1, 1]} : vector<16x96xf32> to vector<16x8xf32>
    %37 = vector.shape_cast %36 : vector<16x8xf32> to vector<2x8x8xf32>
    %38 = vector.extract_strided_slice %15 {offsets = [0, 80], sizes = [16, 8], strides = [1, 1]} : vector<16x96xf32> to vector<16x8xf32>
    %39 = vector.shape_cast %38 : vector<16x8xf32> to vector<2x8x8xf32>
    %40 = vector.extract_strided_slice %15 {offsets = [0, 88], sizes = [16, 8], strides = [1, 1]} : vector<16x96xf32> to vector<16x8xf32>
    %41 = vector.shape_cast %40 : vector<16x8xf32> to vector<2x8x8xf32>
    %42 = tpu.concatenate %35, %37, %39, %41 in 0 : vector<2x8x8xf32>, vector<2x8x8xf32>, vector<2x8x8xf32>, vector<2x8x8xf32> -> vector<8x8x8xf32>
    %c0_15 = arith.constant 0 : index
    %c0_16 = arith.constant 0 : index
    %c0_17 = arith.constant 0 : index
    %43 = vector.load %arg2[%c0_15, %c0_16, %c0_17] : memref<2x8x8xf32, #tpu.memory_space<vmem>>, vector<2x8x8xf32>
    %cst_18 = arith.constant 0.000000e+00 : f32
    %44 = vector.broadcast %cst_18 : f32 to vector<2x8x8xf32>
    %45 = arith.cmpf oeq, %43, %44 : vector<2x8x8xf32>
    %cst_19 = arith.constant -1.000000e+09 : f32
    %cst_20 = arith.constant 0.000000e+00 : f32
    %46 = vector.broadcast %cst_19 : f32 to vector<2x8x8xf32>
    %47 = vector.broadcast %cst_20 : f32 to vector<2x8x8xf32>
    %48 = arith.select %45, %46, %47 : vector<2x8x8xi1>, vector<2x8x8xf32>
    %49 = tpu.concatenate %48, %48, %48, %48 in 0 : vector<2x8x8xf32>, vector<2x8x8xf32>, vector<2x8x8xf32>, vector<2x8x8xf32> -> vector<8x8x8xf32>
    "tpu.trace_start"() <{level = 10 : i32, message = "gqe,gke->gqk"}> : () -> ()
    %cst_21 = arith.constant dense<0.000000e+00> : vector<8x8x8xf32>
    %50 = tpu.matmul %24, %33, %cst_21 {dimension_numbers = #tpu.dot_dimension_numbers<[2], [2], [1], [1], [0, 0, 0, 1, 1, 1], [0], [0]>} : vector<8x8x8xf32>, vector<8x8x8xf32>, vector<8x8x8xf32> -> vector<8x8x8xf32>
    "tpu.trace_stop"() : () -> ()
    %51 = arith.addf %50, %49 : vector<8x8x8xf32>
    %cst_22 = arith.constant dense<0xFF800000> : vector<8x8xf32>
    %52 = vector.multi_reduction <maximumf>, %51, %cst_22 [2] : vector<8x8x8xf32> to vector<8x8xf32>
    %53 = vector.shape_cast %52 : vector<8x8xf32> to vector<8x8x1xf32>
    %54 = vector.broadcast %53 : vector<8x8x1xf32> to vector<8x8x8xf32>
    %55 = arith.subf %51, %54 : vector<8x8x8xf32>
    %56 = math.exp %55 : vector<8x8x8xf32>
    %cst_23 = arith.constant dense<0.000000e+00> : vector<8x8xf32>
    %57 = vector.multi_reduction <add>, %56, %cst_23 [2] : vector<8x8x8xf32> to vector<8x8xf32>
    %58 = vector.shape_cast %57 : vector<8x8xf32> to vector<8x8x1xf32>
    %59 = tpu.reciprocal %58 {approx = true} : vector<8x8x1xf32> -> vector<8x8x1xf32>
    %60 = vector.broadcast %59 : vector<8x8x1xf32> to vector<8x8x8xf32>
    %61 = arith.mulf %56, %60 : vector<8x8x8xf32>
    "tpu.trace_start"() <{level = 10 : i32, message = "gqk,gke->gqe"}> : () -> ()
    %cst_24 = arith.constant dense<0.000000e+00> : vector<8x8x8xf32>
    %62 = tpu.matmul %61, %42, %cst_24 {dimension_numbers = #tpu.dot_dimension_numbers<[2], [1], [1], [2], [0, 0, 0, 1, 1, 2], [0], [0]>} : vector<8x8x8xf32>, vector<8x8x8xf32>, vector<8x8x8xf32> -> vector<8x8x8xf32>
    "tpu.trace_stop"() : () -> ()
    %63 = vector.extract_strided_slice %62 {offsets = [0, 0, 0], sizes = [2, 8, 8], strides = [1, 1, 1]} : vector<8x8x8xf32> to vector<2x8x8xf32>
    %64 = vector.shape_cast %63 : vector<2x8x8xf32> to vector<16x8xf32>
    %65 = vector.extract_strided_slice %62 {offsets = [2, 0, 0], sizes = [2, 8, 8], strides = [1, 1, 1]} : vector<8x8x8xf32> to vector<2x8x8xf32>
    %66 = vector.shape_cast %65 : vector<2x8x8xf32> to vector<16x8xf32>
    %67 = vector.extract_strided_slice %62 {offsets = [4, 0, 0], sizes = [2, 8, 8], strides = [1, 1, 1]} : vector<8x8x8xf32> to vector<2x8x8xf32>
    %68 = vector.shape_cast %67 : vector<2x8x8xf32> to vector<16x8xf32>
    %69 = vector.extract_strided_slice %62 {offsets = [6, 0, 0], sizes = [2, 8, 8], strides = [1, 1, 1]} : vector<8x8x8xf32> to vector<2x8x8xf32>
    %70 = vector.shape_cast %69 : vector<2x8x8xf32> to vector<16x8xf32>
    %71 = tpu.concatenate %64, %66, %68, %70 in 1 : vector<16x8xf32>, vector<16x8xf32>, vector<16x8xf32>, vector<16x8xf32> -> vector<16x32xf32>
    %cst_25 = arith.constant dense<0.000000e+00> : vector<16x32xf32>
    %72 = tpu.matmul %71, %2, %cst_25 {dimension_numbers = #tpu.dot_dimension_numbers<[1], [0], [0], [1], [0, 0, 1, 1], [], []>} : vector<16x32xf32>, vector<32x32xf32>, vector<16x32xf32> -> vector<16x32xf32>
    %73 = vector.broadcast %6 : vector<1x32xf32> to vector<16x32xf32>
    %74 = arith.addf %72, %73 : vector<16x32xf32>
    %75 = arith.addf %0, %74 : vector<16x32xf32>
    %cst_26 = arith.constant dense<0.000000e+00> : vector<16xf32>
    %76 = vector.multi_reduction <add>, %75, %cst_26 [1] : vector<16x32xf32> to vector<16xf32>
    %77 = vector.shape_cast %76 : vector<16xf32> to vector<16x1xf32>
    %cst_27 = arith.constant 3.200000e+01 : f32
    %78 = vector.broadcast %cst_27 : f32 to vector<16x1xf32>
    %79 = arith.divf %77, %78 : vector<16x1xf32>
    %80 = vector.broadcast %79 : vector<16x1xf32> to vector<16x32xf32>
    %81 = arith.subf %75, %80 : vector<16x32xf32>
    %82 = arith.mulf %81, %81 : vector<16x32xf32>
    %cst_28 = arith.constant dense<0.000000e+00> : vector<16xf32>
    %83 = vector.multi_reduction <add>, %82, %cst_28 [1] : vector<16x32xf32> to vector<16xf32>
    %84 = vector.shape_cast %83 : vector<16xf32> to vector<16x1xf32>
    %cst_29 = arith.constant 3.200000e+01 : f32
    %85 = vector.broadcast %cst_29 : f32 to vector<16x1xf32>
    %86 = arith.divf %84, %85 : vector<16x1xf32>
    %87 = vector.broadcast %79 : vector<16x1xf32> to vector<16x32xf32>
    %88 = arith.subf %75, %87 : vector<16x32xf32>
    %cst_30 = arith.constant 9.99999974E-6 : f32
    %89 = vector.broadcast %cst_30 : f32 to vector<16x1xf32>
    %90 = arith.addf %86, %89 : vector<16x1xf32>
    %91 = math.rsqrt %90 : vector<16x1xf32>
    %92 = vector.broadcast %91 : vector<16x1xf32> to vector<16x32xf32>
    %93 = arith.mulf %88, %92 : vector<16x32xf32>
    %94 = vector.broadcast %9 : vector<1x32xf32> to vector<16x32xf32>
    %95 = arith.mulf %93, %94 : vector<16x32xf32>
    %96 = vector.broadcast %10 : vector<1x32xf32> to vector<16x32xf32>
    %97 = arith.addf %95, %96 : vector<16x32xf32>
    %cst_31 = arith.constant dense<0.000000e+00> : vector<16x64xf32>
    %98 = tpu.matmul %97, %3, %cst_31 {dimension_numbers = #tpu.dot_dimension_numbers<[1], [0], [0], [1], [0, 0, 1, 1], [], []>} : vector<16x32xf32>, vector<32x64xf32>, vector<16x64xf32> -> vector<16x64xf32>
    %99 = vector.broadcast %7 : vector<1x64xf32> to vector<16x64xf32>
    %100 = arith.addf %98, %99 : vector<16x64xf32>
    %cst_32 = arith.constant 0.000000e+00 : f32
    %101 = vector.broadcast %cst_32 : f32 to vector<16x64xf32>
    %102 = arith.maximumf %100, %101 : vector<16x64xf32>
    %cst_33 = arith.constant dense<0.000000e+00> : vector<16x32xf32>
    %103 = tpu.matmul %102, %4, %cst_33 {dimension_numbers = #tpu.dot_dimension_numbers<[1], [0], [0], [1], [0, 0, 1, 1], [], []>} : vector<16x64xf32>, vector<64x32xf32>, vector<16x32xf32> -> vector<16x32xf32>
    %104 = vector.broadcast %8 : vector<1x32xf32> to vector<16x32xf32>
    %105 = arith.addf %103, %104 : vector<16x32xf32>
    %106 = arith.addf %97, %105 : vector<16x32xf32>
    %cst_34 = arith.constant dense<0.000000e+00> : vector<16xf32>
    %107 = vector.multi_reduction <add>, %106, %cst_34 [1] : vector<16x32xf32> to vector<16xf32>
    %108 = vector.shape_cast %107 : vector<16xf32> to vector<16x1xf32>
    %cst_35 = arith.constant 3.200000e+01 : f32
    %109 = vector.broadcast %cst_35 : f32 to vector<16x1xf32>
    %110 = arith.divf %108, %109 : vector<16x1xf32>
    %111 = vector.broadcast %110 : vector<16x1xf32> to vector<16x32xf32>
    %112 = arith.subf %106, %111 : vector<16x32xf32>
    %113 = arith.mulf %112, %112 : vector<16x32xf32>
    %cst_36 = arith.constant dense<0.000000e+00> : vector<16xf32>
    %114 = vector.multi_reduction <add>, %113, %cst_36 [1] : vector<16x32xf32> to vector<16xf32>
    %115 = vector.shape_cast %114 : vector<16xf32> to vector<16x1xf32>
    %cst_37 = arith.constant 3.200000e+01 : f32
    %116 = vector.broadcast %cst_37 : f32 to vector<16x1xf32>
    %117 = arith.divf %115, %116 : vector<16x1xf32>
    %118 = vector.broadcast %110 : vector<16x1xf32> to vector<16x32xf32>
    %119 = arith.subf %106, %118 : vector<16x32xf32>
    %cst_38 = arith.constant 9.99999974E-6 : f32
    %120 = vector.broadcast %cst_38 : f32 to vector<16x1xf32>
    %121 = arith.addf %117, %120 : vector<16x1xf32>
    %122 = math.rsqrt %121 : vector<16x1xf32>
    %123 = vector.broadcast %122 : vector<16x1xf32> to vector<16x32xf32>
    %124 = arith.mulf %119, %123 : vector<16x32xf32>
    %125 = vector.broadcast %11 : vector<1x32xf32> to vector<16x32xf32>
    %126 = arith.mulf %124, %125 : vector<16x32xf32>
    %127 = vector.broadcast %12 : vector<1x32xf32> to vector<16x32xf32>
    %128 = arith.addf %126, %127 : vector<16x32xf32>
    %c0_39 = arith.constant 0 : index
    %c0_40 = arith.constant 0 : index
    %129 = vector.load %arg4[%c0_39, %c0_40] : memref<16x32xf32, #tpu.memory_space<vmem>>, vector<16x32xf32>
    tpu.vector_store %arg4[%c0_39, %c0_40], %128 {strides = array<i32>} : memref<16x32xf32, #tpu.memory_space<vmem>>, vector<16x32xf32>,
    return
  }
  func.func @transform_0(%arg0: i32) -> (i32, i32) {
    %c0_i32 = arith.constant 0 : i32
    %c0_i32_0 = arith.constant 0 : i32
    %c0_i32_1 = arith.constant 0 : i32
    return %c0_i32, %c0_i32_0 : i32, i32
  }
  func.func @transform_1(%arg0: i32) -> (i32, i32, i32) {
    %c0_i32 = arith.constant 0 : i32
    %c0_i32_0 = arith.constant 0 : i32
    %c0_i32_1 = arith.constant 0 : i32
    %c0_i32_2 = arith.constant 0 : i32
    return %c0_i32, %c0_i32_0, %c0_i32_1 : i32, i32, i32
  }
  func.func @transform_2(%arg0: i32) -> (i32, i32) {
    %c0_i32 = arith.constant 0 : i32
    %c0_i32_0 = arith.constant 0 : i32
    %c0_i32_1 = arith.constant 0 : i32
    return %c0_i32, %c0_i32_0 : i32, i32
  }
  func.func @transform_3(%arg0: i32) -> (i32, i32) {
    %c0_i32 = arith.constant 0 : i32
    %c0_i32_0 = arith.constant 0 : i32
    %c0_i32_1 = arith.constant 0 : i32
    return %c0_i32, %c0_i32_0 : i32, i32
  }
}

</mosaic_0001>

<bundles_post_ra>
// kernel: encoder_layer.1
= control target key start
LH: loop header
LB: loop body
LE: loop exit
PB: predicated region body
PF: predicated region fallthrough
CT: control target
= control target key end

     0   :  { %8 = vsyncpa [#allocation3], 0  ;;  %s2537_s0 = inlined_call_operand.hbm [shape: f32[16,32], index: 0, kind: input, shape index: {}]   ;;  %s2538_s1 = inlined_call_operand.hbm [shape: f32[2,8,8], index: 1, kind: input, shape index: {}]   ;;  %s2539_s2 = inlined_call_operand.hbm [shape: f32[136,128], index: 2, kind: input, shape index: {}]   ;;  %s2540_s3 = inlined_call_operand.hbm [shape: f32[16,32], index: 3, kind: output, shape index: {}]  }
   0x1   :  { %9 = vsyncpa [#allocation6], 0 }
   0x2   :  { %10 = vsyncpa [#allocation4], 0  ;;  %s2273_s12 = smov [#allocation5]   ;;  %s2274_s14 = smov [#allocation2]  }
   0x3   :  { %s28_s13 = sshll.u32 %s2273_s12, 4  ;;  %s16_s15 = sshll.u32 %s2274_s14, 4  ;;  %s29_s13 = int_to_ptr.vmem [resolvable:$true] %s28_s13  ;;  %s17_s15 = int_to_ptr.vmem [resolvable:$true] %s16_s15 }
   0x4   :  { %s2195_s16 = scalar_lea.vmem %s29_s13, 256  ;;  %p2200_p1 = scmp.lt.s32.totalorder %s29_s13, %s29_s13 }
   0x5   :  { %p2196_p0 = scmp.ne.s32.totalorder %s29_s13, %s2195_s16  ;;  %p2201_p2 = scmp.lt.s32.totalorder %s2195_s16, %s2195_s16 }
   0x7   :  { %p2202_p3 = por %p2201_p2, %p2200_p1 }
   0x9   :  { %p2203_p4 = pnand %p2202_p3, %p2196_p0 }
   0xb   :  { %2206 = shalt.err (!%p2203_p4)
}
   0xc   :  { %s2275_s17 = smov 128   ;;  %s2276_s18 = smov 8  }
   0xd   :  { %34 = dma.hbm_to_vmem [thread:$0]  %s2538_s1, 256, %s29_s13, [#allocation6], %s2275_s17, %s2275_s17, %s2276_s18  }
   0xe   :  { %s2215_s21 = scalar_lea.vmem %s17_s15, 256  ;;  %p2220_p6 = scmp.lt.s32.totalorder %s17_s15, %s17_s15 }
   0xf   :  { %p2216_p5 = scmp.ne.s32.totalorder %s17_s15, %s2215_s21  ;;  %p2221_p7 = scmp.lt.s32.totalorder %s2215_s21, %s2215_s21 }
  0x11   :  { %p2222_p8 = por %p2221_p7, %p2220_p6 }
  0x13   :  { %p2223_p9 = pnand %p2222_p8, %p2216_p5 }
  0x15   :  { %2226 = shalt.err (!%p2223_p9)
}
  0x16   :  { %22 = dma.hbm_to_vmem [thread:$0]  %s2537_s0, 256, %s17_s15, [#allocation3], %s2275_s17, %s2275_s17, %s2276_s18  }
  0x17   :  { %s2277_s24 = smov [#allocation7]  }
  0x18   :  { %s40_s25 = sshll.u32 %s2277_s24, 4  ;;  %s41_s25 = int_to_ptr.vmem [resolvable:$true] %s40_s25 }
  0x19   :  { %s2235_s26 = scalar_lea.vmem %s41_s25, 2176  ;;  %p2240_p11 = scmp.lt.s32.totalorder %s41_s25, %s41_s25 }
  0x1a   :  { %p2236_p10 = scmp.ne.s32.totalorder %s41_s25, %s2235_s26  ;;  %p2241_p12 = scmp.lt.s32.totalorder %s2235_s26, %s2235_s26 }
  0x1c   :  { %p2242_p13 = por %p2241_p12, %p2240_p11 }
  0x1e   :  { %p2243_p0 = pnand %p2242_p13, %p2236_p10 }
  0x20   :  { %2246 = shalt.err (!%p2243_p0)
}
  0x21   :  { %46 = dma.hbm_to_vmem [thread:$0]  %s2539_s2, 2176, %s41_s25, [#allocation6], %s2275_s17, %s2275_s17, %s2276_s18  }
  0x22   :  { %2267 = dma.done.wait [#allocation3], 256  }
  0x23   :  { %2268 = vsyncadd [#allocation3], 4294967040 }
  0x24   :  { %2269 = dma.done.wait [#allocation6], 2432  }
  0x25   :  { %2270 = vsyncadd [#allocation6], 4294964864  ;;  %vm86_vm0 = vcmask 261120   ;;  %v61_v0 = vld [vmem:[#allocation7 + $0x18] sm:$0xff]  ;;  %v60_v1 = vld [vmem:[#allocation7 + $0x10] sm:$0xff]  ;;  %v2278_v7 = vmov 0.0  }
  0x26   :  { %2000 = vmatprep.subr.mxu1 %v61_v0  ;;  %v2326_v2 = vld [vmem:[#allocation2] sm:$0xff]  ;;  %v59_v3 = vld [vmem:[#allocation7 + $0x8] sm:$0xff]  ;;  %2021 = vmatprep.subr.mxu0 %v2278_v7  ;;  %s2279_s0 = smov 112   ;;  %s2280_s2 = smov 120   ;;  %vm2281_vm1 = vmmov 0   ;;  %vm190_vm2 = vcmask 64512  }
  0x27   :  { %2001 = vmatpush3.msra.mxu1 %v61_v0  ;;  %2008 = vmatprep.mubr.msk.f32.mxu1 %vm86_vm0, %v2326_v2  ;;  %v58_v4 = vld [vmem:[#allocation7] sm:$0xff]  ;;  %v2330_v5 = vld [vmem:[#allocation2 + $0x8] sm:$0xff]  ;;  %s2282_s28 = smov 104   ;;  %s2283_s29 = smov 96   ;;  %v182_v26 = vld [vmem:[#allocation5] sm:$0xff]  ;;  %vm1519_vm5 = vcmask 130048  }
  0x28   :  { %2002 = vmatprep.subr.mxu1 %v60_v1  ;;  %v1900_v8 = vld [vmem:[#allocation7 + $0x80] ss:$0 sm:$0xff]  ;;  %2023 = vmatprep.mubr.msk.f32.mxu0 %vm2281_vm1, %v2278_v7  ;;  %vm184_vm3 = vcmp.eq.f32.partialorder %v182_v26, 0.0  ;;  %v183_v27 = vld [vmem:[#allocation5 + $0x8] sm:$0xff]  ;;  %s2284_s30 = smov 64   ;;  %s2285_s4 = smov 16  }
  0x29   :  { %2003 = vmatpush3.msra.mxu1 %v60_v1  ;;  %v186_v28 = vsel %vm184_vm3, -1e+09, %v2278_v7  ;;  %vm185_vm4 = vcmp.eq.f32.partialorder %v183_v27, 0.0  ;;  %s2286_s5 = smov 24   ;;  %vm1522_vm6 = vcmask 195584   ;;  %vm1758_vm7 = vcmask 523264  }
  0x2a   :  { %2004 = vmatprep.subr.mxu1 %v59_v3  ;;  %v187_v32 = vsel %vm185_vm4, -1e+09, %v2278_v7  ;;  %s2287_s6 = smov [#allocation8]  }
  0x2b   :  { %2005 = vmatpush3.msra.mxu1 %v59_v3  ;;  %s1887_s7 = sshll.u32 %s2287_s6, 4  ;;  %s1888_s7 = int_to_ptr.vmem [resolvable:$true] %s1887_s7 }
  0x2c   :  { %2006 = vmatprep.subr.mxu1 %v58_v4  ;;  %s2247_s8 = scalar_lea.vmem %s1888_s7, 256  ;;  %p2252_p2 = scmp.lt.s32.totalorder %s1888_s7, %s1888_s7 }
  0x2d   :  { %2007 = vmatpush3.msra.mxu1 %v58_v4  ;;  %p2248_p1 = scmp.ne.s32.totalorder %s1888_s7, %s2247_s8  ;;  %p2253_p3 = scmp.lt.s32.totalorder %s2247_s8, %s2247_s8 }
  0x2e   :  { %2009 = vmatmul.mubr.msk.f32.vlgmr.msra.gmra.mxu1 %vm86_vm0, %v2330_v5  ;;  %2011 = vmatprep.subr.mxu1 %v2278_v7 }
  0x2f   :  { %2013 = vmatprep.mubr.msk.f32.mxu1 %vm2281_vm1, %v2278_v7  ;;  %p2254_p4 = por %p2253_p3, %p2252_p2 }
  0x31   :  { %p2255_p5 = pnand %p2254_p4, %p2248_p1 }
  0xee   :  { %v2010_v6 = vpop.f32.mrf.mxu1 }
  0xef   :  { %v2344_v11 = vadd.f32 %v2010_v6, %v1900_v8 }
  0xf0   :  { %v159_v9 = vpop.f32.mrf.mxu1 }
  0xf1   :  { %v2336_v10 = vadd.f32 %v1900_v8, %v159_v9 }
  0xf3   :  { %174 = vrot.lane.b32.xlu1 %v2336_v10, %s2279_s0  ;;  %170 = vrot.lane.b32.xlu0 %v2336_v10, %s2280_s2 }
  0xf7   :  { %176 = vrot.lane.b32.xlu1 %v2344_v11, %s2279_s0  ;;  %172 = vrot.lane.b32.xlu0 %v2344_v11, %s2280_s2 }
  0xfb   :  { %180 = vrot.lane.b32.xlu1 %v2344_v11, %s2282_s28  ;;  %178 = vrot.lane.b32.xlu0 %v2336_v10, %s2282_s28 }
  0xff   :  { %265 = vrot.lane.b32.xlu1 %v2344_v11, %s2283_s29  ;;  %188 = vrot.lane.b32.xlu0 %v2336_v10, %s2283_s29 }
 0x165   :  { %v2354_v12 = vpop.permute.xlu1 %174  ;;  %v2356_v13 = vpop.permute.xlu0 %170 }
 0x166   :  { %341 = vrot.lane.b32.xlu0 %v2356_v13, %s2283_s29 }
 0x169   :  { %v2360_v14 = vpop.permute.xlu1 %176  ;;  %v2362_v15 = vpop.permute.xlu0 %172 }
 0x16a   :  { %493 = vrot.lane.b32.xlu0 %v2354_v12, %s2283_s29  ;;  %417 = vrot.lane.b32.xlu1 %v2362_v15, %s2283_s29 }
 0x16d   :  { %v2368_v16 = vpop.permute.xlu0 %178  ;;  %v2374_v17 = vpop.permute.xlu1 %180 }
 0x16e   :  { %569 = vrot.lane.b32.xlu1 %v2360_v14, %s2283_s29  ;;  %645 = vrot.lane.b32.xlu0 %v2368_v16, %s2283_s29 }
 0x171   :  { %v189_v18 = vpop.permute.xlu0 %188  ;;  %v266_v19 = vpop.permute.xlu1 %265 }
 0x172   :  { %721 = vrot.lane.b32.xlu1 %v2374_v17, %s2283_s29  ;;  %2012 = vmatpush3.xpose.msk.msra.mxu1 %vm190_vm2, %v189_v18 }
 0x173   :  { %2016 = vmatprep.subr.mxu1 %v2278_v7 }
 0x175   :  { %2014 = vmatmul.mubr.msk.f32.vlgmr.msra.gmra.mxu1 %vm190_vm2, %v2336_v10 }
 0x176   :  { %2017 = vmatpush3.xpose.msk.msra.mxu1 %vm190_vm2, %v266_v19  ;;  %2018 = vmatprep.mubr.msk.f32.mxu1 %vm2281_vm1, %v2278_v7 }
 0x177   :  { %2026 = vmatprep.subr.mxu1 %v2278_v7 }
 0x179   :  { %2019 = vmatmul.mubr.msk.f32.vlgmr.msra.gmra.mxu1 %vm190_vm2, %v2344_v11 }
 0x17a   :  { %2028 = vmatprep.mubr.msk.f32.mxu1 %vm2281_vm1, %v2278_v7 }
 0x1d8   :  { %v342_v20 = vpop.permute.xlu0 %341 }
 0x1d9   :  { %2022 = vmatpush3.xpose.msk.msra.mxu0 %vm190_vm2, %v342_v20 }
 0x1da   :  { %2031 = vmatprep.subr.mxu0 %v2278_v7 }
 0x1dc   :  { %v418_v21 = vpop.permute.xlu1 %417  ;;  %2024 = vmatmul.mubr.msk.f32.vlgmr.msra.gmra.mxu0 %vm190_vm2, %v2356_v13  ;;  %v494_v22 = vpop.permute.xlu0 %493 }
 0x1dd   :  { %2027 = vmatpush3.xpose.msk.msra.mxu1 %vm190_vm2, %v418_v21  ;;  %2032 = vmatpush3.xpose.msk.msra.mxu0 %vm190_vm2, %v494_v22 }
 0x1de   :  { %2033 = vmatprep.mubr.msk.f32.mxu0 %vm2281_vm1, %v2278_v7  ;;  %2036 = vmatprep.subr.mxu1 %v2278_v7 }
 0x1df   :  { %2041 = vmatprep.subr.mxu0 %v2278_v7 }
 0x1e0   :  { %v570_v23 = vpop.permute.xlu1 %569  ;;  %2029 = vmatmul.mubr.msk.f32.vlgmr.msra.gmra.mxu1 %vm190_vm2, %v2362_v15  ;;  %2034 = vmatmul.mubr.msk.f32.vlgmr.msra.gmra.mxu0 %vm190_vm2, %v2354_v12  ;;  %v646_v24 = vpop.permute.xlu0 %645 }
 0x1e1   :  { %2037 = vmatpush3.xpose.msk.msra.mxu1 %vm190_vm2, %v570_v23  ;;  %2042 = vmatpush3.xpose.msk.msra.mxu0 %vm190_vm2, %v646_v24 }
 0x1e2   :  { %2038 = vmatprep.mubr.msk.f32.mxu1 %vm2281_vm1, %v2278_v7  ;;  %2043 = vmatprep.mubr.msk.f32.mxu0 %vm2281_vm1, %v2278_v7 }
 0x1e3   :  { %2046 = vmatprep.subr.mxu1 %v2278_v7  ;;  %2051 = vmatprep.subr.mxu0 %v2278_v7 }
 0x1e4   :  { %v722_v25 = vpop.permute.xlu1 %721  ;;  %2039 = vmatmul.mubr.msk.f32.vlgmr.msra.gmra.mxu1 %vm190_vm2, %v2360_v14  ;;  %2044 = vmatmul.mubr.msk.f32.vlgmr.msra.gmra.mxu0 %vm190_vm2, %v2368_v16 }
 0x1e5   :  { %2047 = vmatpush3.xpose.msk.msra.mxu1 %vm190_vm2, %v722_v25  ;;  %2048 = vmatprep.mubr.msk.f32.mxu1 %vm2281_vm1, %v2278_v7 }
 0x1e6   :  { %2056 = vmatprep.subr.mxu1 %v2278_v7  ;;  %2053 = vmatprep.mubr.msk.f32.mxu0 %vm2281_vm1, %v2278_v7 }
 0x1e8   :  { %2049 = vmatmul.mubr.msk.f32.vlgmr.msra.gmra.mxu1 %vm190_vm2, %v2374_v17 }
 0x1e9   :  { %2058 = vmatprep.mubr.msk.f32.mxu1 %vm2281_vm1, %v2278_v7 }
 0x235   :  { %v261_v29 = vpop.f32.mrf.mxu1 }
 0x236   :  { %v262_v30 = vadd.f32 %v261_v29, %v186_v28 }
 0x237   :  { %v2015_v31 = vpop.f32.mrf.mxu1 }
 0x238   :  { %v797_v33 = vsel %vm190_vm2, %v262_v30, -inf }
 0x239   :  { %798 = vmax.xlane.f32.xlu0 %v797_v33  ;;  %v337_v34 = vpop.f32.mrf.mxu1 }
 0x23a   :  { %v338_v35 = vadd.f32 %v337_v34, %v187_v32 }
 0x23b   :  { %v2020_v36 = vpop.f32.mrf.mxu1 }
 0x23c   :  { %v800_v37 = vsel %vm190_vm2, %v338_v35, -inf }
 0x23d   :  { %801 = vmax.xlane.f32.xlu1 %v800_v37 }
 0x29c   :  { %v413_v38 = vpop.f32.mrf.mxu0 }
 0x29d   :  { %v414_v39 = vadd.f32 %v413_v38, %v186_v28 }
 0x29e   :  { %v2025_v40 = vpop.f32.mrf.mxu0 }
 0x29f   :  { %v803_v41 = vsel %vm190_vm2, %v414_v39, -inf }
 0x2a0   :  { %v489_v42 = vpop.f32.mrf.mxu1  ;;  %804 = vmax.xlane.f32.xlu0 %v803_v41  ;;  %v565_v43 = vpop.f32.mrf.mxu0 }
 0x2a1   :  { %v490_v44 = vadd.f32 %v489_v42, %v187_v32  ;;  %v566_v45 = vadd.f32 %v565_v43, %v186_v28 }
 0x2a2   :  { %v2030_v46 = vpop.f32.mrf.mxu1  ;;  %v2035_v47 = vpop.f32.mrf.mxu0 }
 0x2a3   :  { %v806_v48 = vsel %vm190_vm2, %v490_v44, -inf  ;;  %v809_v49 = vsel %vm190_vm2, %v566_v45, -inf }
 0x2a4   :  { %v641_v50 = vpop.f32.mrf.mxu1  ;;  %807 = vmax.xlane.f32.xlu0 %v806_v48  ;;  %810 = vmax.xlane.f32.xlu1 %v809_v49  ;;  %v717_v51 = vpop.f32.mrf.mxu0 }
 0x2a5   :  { %v642_v52 = vadd.f32 %v641_v50, %v187_v32  ;;  %v718_v53 = vadd.f32 %v717_v51, %v186_v28 }
 0x2a6   :  { %v2040_v54 = vpop.f32.mrf.mxu1  ;;  %v2045_v55 = vpop.f32.mrf.mxu0 }
 0x2a7   :  { %v812_v56 = vsel %vm190_vm2, %v642_v52, -inf  ;;  %v815_v57 = vsel %vm190_vm2, %v718_v53, -inf }
 0x2a8   :  { %v793_v58 = vpop.f32.mrf.mxu1  ;;  %813 = vmax.xlane.f32.xlu0 %v812_v56  ;;  %816 = vmax.xlane.f32.xlu1 %v815_v57 }
 0x2a9   :  { %v794_v59 = vadd.f32 %v793_v58, %v187_v32 }
 0x2aa   :  { %v2050_v60 = vpop.f32.mrf.mxu1 }
 0x2ab   :  { %v818_v61 = vsel %vm190_vm2, %v794_v59, -inf }
 0x2ac   :  { %819 = vmax.xlane.f32.xlu0 %v818_v61 }
 0x2b9   :  { %885 = vrot.lane.b32.xlu1 %v2336_v10, %s2284_s30 }
 0x2bd   :  { %1037 = vrot.lane.b32.xlu1 %v2356_v13, %s2284_s30 }
 0x2c1   :  { %1113 = vrot.lane.b32.xlu1 %v2362_v15, %s2284_s30 }
 0x2c2   :  { %961 = vrot.lane.b32.xlu0 %v2344_v11, %s2284_s30  ;;  %v799_v0 = vpop.xlane.xlu0 %798 }
 0x2c3   :  { %v821_v1 = vsub.f32 %v262_v30, %v799_v0 }
 0x2c5   :  { %1265 = vrot.lane.b32.xlu1 %v2360_v14, %s2284_s30  ;;  %v829_v4 = vmul.f32 1.442695, %v821_v1 }
 0x2c6   :  { %1189 = vrot.lane.b32.xlu0 %v2354_v12, %s2284_s30  ;;  %v802_v62 = vpop.xlane.xlu1 %801 }
 0x2c7   :  { %v822_v63 = vsub.f32 %v338_v35, %v802_v62 }
 0x2c9   :  { %v831_v3 = vmul.f32 1.442695, %v822_v63 }
 0x2cb   :  { %2147 = vpow2.f32 %v831_v3 }
 0x2cc   :  { %2149 = vpow2.f32 %v829_v4 }
 0x2d8   :  { %v2448_v6 = vpop.eup %2147 }
 0x2d9   :  { %v848_v8 = vsel %vm190_vm2, %v2448_v6, 0.0  ;;  %v2452_v9 = vpop.eup %2149 }
 0x2da   :  { %v845_v10 = vsel %vm190_vm2, %v2452_v9, 0.0 }
 0x2e5   :  { %849 = vadd.xlane.f32.xlu0 %v848_v8 }
 0x2e9   :  { %846 = vadd.xlane.f32.xlu1 %v845_v10 }
 0x329   :  { %v805_v11 = vpop.xlane.xlu0 %804 }
 0x32a   :  { %v823_v12 = vsub.f32 %v414_v39, %v805_v11 }
 0x32c   :  { %v833_v13 = vmul.f32 1.442695, %v823_v12 }
 0x32d   :  { %v811_v14 = vpop.xlane.xlu1 %810  ;;  %v808_v15 = vpop.xlane.xlu0 %807 }
 0x32e   :  { %2151 = vpow2.f32 %v833_v13  ;;  %v825_v18 = vsub.f32 %v566_v45, %v811_v14  ;;  %v824_v19 = vsub.f32 %v490_v44, %v808_v15 }
 0x330   :  { %v837_v20 = vmul.f32 1.442695, %v825_v18  ;;  %v835_v21 = vmul.f32 1.442695, %v824_v19  ;;  %v65_v18 = vld [vmem:[#allocation7 + $0x38] sm:$0xff]  ;;  %v2502_v19 = vld [vmem:[#allocation7 + $0x30] sm:$0xff] }
 0x331   :  { %v817_v22 = vpop.xlane.xlu1 %816  ;;  %v814_v23 = vpop.xlane.xlu0 %813 }
 0x332   :  { %2153 = vpow2.f32 %v837_v20  ;;  %v827_v24 = vsub.f32 %v718_v53, %v817_v22  ;;  %v826_v25 = vsub.f32 %v642_v52, %v814_v23  ;;  %v63_v20 = vld [vmem:[#allocation7 + $0x28] sm:$0xff] }
 0x333   :  { %2155 = vpow2.f32 %v835_v21  ;;  %v62_v21 = vld [vmem:[#allocation7 + $0x20] sm:$0xff] }
 0x334   :  { %v841_v26 = vmul.f32 1.442695, %v827_v24  ;;  %v839_v27 = vmul.f32 1.442695, %v826_v25 }
 0x335   :  { %v886_v28 = vpop.permute.xlu1 %885  ;;  %v820_v29 = vpop.xlane.xlu0 %819 }
 0x336   :  { %2157 = vpow2.f32 %v841_v26  ;;  %v828_v30 = vsub.f32 %v794_v59, %v820_v29  ;;  %2052 = vmatpush3.msra.mxu0 %v886_v28 }
 0x337   :  { %2159 = vpow2.f32 %v839_v27  ;;  %2061 = vmatprep.subr.mxu0 %v2278_v7 }
 0x338   :  { %v843_v31 = vmul.f32 1.442695, %v828_v30 }
 0x339   :  { %v962_v32 = vpop.permute.xlu0 %961  ;;  %v1038_v45 = vpop.permute.xlu1 %1037 }
 0x33a   :  { %2161 = vpow2.f32 %v843_v31  ;;  %2057 = vmatpush3.msra.mxu1 %v962_v32 }
 0x33b   :  { %v2152_v33 = vpop.eup %2151  ;;  %2066 = vmatprep.subr.mxu1 %v2278_v7 }
 0x33c   :  { %v851_v34 = vsel %vm190_vm2, %v2152_v33, 0.0 }
 0x33d   :  { %852 = vadd.xlane.f32.xlu1 %v851_v34  ;;  %v1114_v46 = vpop.permute.xlu1 %1113  ;;  %v1190_v47 = vpop.permute.xlu0 %1189 }
 0x33f   :  { %v2154_v35 = vpop.eup %2153 }
 0x340   :  { %v2156_v36 = vpop.eup %2155  ;;  %v857_v37 = vsel %vm190_vm2, %v2154_v35, 0.0 }
 0x341   :  { %858 = vadd.xlane.f32.xlu1 %v857_v37  ;;  %v854_v38 = vsel %vm190_vm2, %v2156_v36, 0.0  ;;  %v1266_v48 = vpop.permute.xlu1 %1265 }
 0x342   :  { %855 = vadd.xlane.f32.xlu0 %v854_v38 }
 0x343   :  { %v2158_v39 = vpop.eup %2157 }
 0x344   :  { %v2461_v40 = vpop.eup %2159  ;;  %v863_v41 = vsel %vm190_vm2, %v2158_v39, 0.0 }
 0x345   :  { %864 = vadd.xlane.f32.xlu1 %v863_v41  ;;  %v860_v42 = vsel %vm190_vm2, %v2461_v40, 0.0 }
 0x346   :  { %861 = vadd.xlane.f32.xlu0 %v860_v42 }
 0x347   :  { %v2466_v43 = vpop.eup %2161 }
 0x348   :  { %v866_v44 = vsel %vm190_vm2, %v2466_v43, 0.0 }
 0x34a   :  { %867 = vadd.xlane.f32.xlu0 %v866_v44 }
 0x356   :  { %1417 = vrot.lane.b32.xlu1 %v2374_v17, %s2284_s30 }
 0x360   :  { %1341 = vrot.lane.b32.xlu0 %v2368_v16, %s2284_s30 }
 0x36e   :  { %v850_v49 = vpop.xlane.xlu0 %849 }
 0x36f   :  { %2163 = vrcp.f32 %v850_v49 }
 0x372   :  { %v847_v50 = vpop.xlane.xlu1 %846 }
 0x373   :  { %2165 = vrcp.f32 %v847_v50 }
 0x37c   :  { %v2164_v51 = vpop.eup %2163 }
 0x37d   :  { %v878_v52 = vmul.f32 %v2164_v51, %v2448_v6 }
 0x37f   :  { %2059 = vmatmul.mubr.msk.f32.vlgmr.msra.gmra.mxu1 %vm190_vm2, %v878_v52 }
 0x380   :  { %v2166_v53 = vpop.eup %2165  ;;  %2067 = vmatpush3.msra.mxu1 %v1114_v46  ;;  %2068 = vmatprep.mubr.msk.f32.mxu1 %vm2281_vm1, %v2278_v7 }
 0x381   :  { %v877_v16 = vmul.f32 %v2166_v53, %v2452_v9  ;;  %2076 = vmatprep.subr.mxu1 %v2278_v7 }
 0x383   :  { %2054 = vmatmul.mubr.msk.f32.vlgmr.msra.gmra.mxu0 %vm190_vm2, %v877_v16 }
 0x384   :  { %2062 = vmatpush3.msra.mxu0 %v1038_v45  ;;  %2063 = vmatprep.mubr.msk.f32.mxu0 %vm2281_vm1, %v2278_v7  ;;  %v1927_v45 = vld [vmem:[#allocation7 + $0x81] ss:$0 sm:$0xff] }
 0x385   :  { %2071 = vmatprep.subr.mxu0 %v2278_v7 }
 0x3c6   :  { %v853_v17 = vpop.xlane.xlu1 %852 }
 0x3c7   :  { %2167 = vrcp.f32 %v853_v17 }
 0x3ca   :  { %v859_v54 = vpop.xlane.xlu1 %858 }
 0x3cb   :  { %2169 = vrcp.f32 %v859_v54  ;;  %v856_v55 = vpop.xlane.xlu0 %855 }
 0x3cc   :  { %2171 = vrcp.f32 %v856_v55 }
 0x3ce   :  { %v865_v56 = vpop.xlane.xlu1 %864 }
 0x3cf   :  { %2173 = vrcp.f32 %v865_v56  ;;  %v862_v57 = vpop.xlane.xlu0 %861 }
 0x3d0   :  { %2175 = vrcp.f32 %v862_v57 }
 0x3d2   :  { %v1418_v9 = vpop.permute.xlu1 %1417 }
 0x3d3   :  { %v868_v58 = vpop.xlane.xlu0 %867 }
 0x3d4   :  { %v2168_v59 = vpop.eup %2167  ;;  %2177 = vrcp.f32 %v868_v58 }
 0x3d5   :  { %v879_v60 = vmul.f32 %v2168_v59, %v2152_v33 }
 0x3d7   :  { %2064 = vmatmul.mubr.msk.f32.vlgmr.msra.gmra.mxu0 %vm190_vm2, %v879_v60  ;;  %v1342_v1 = vpop.permute.xlu0 %1341 }
 0x3d8   :  { %v2170_v61 = vpop.eup %2169  ;;  %2072 = vmatpush3.msra.mxu0 %v1190_v47  ;;  %2073 = vmatprep.mubr.msk.f32.mxu0 %vm2281_vm1, %v2278_v7 }
 0x3d9   :  { %v2172_v62 = vpop.eup %2171  ;;  %2081 = vmatprep.subr.mxu0 %v2278_v7  ;;  %v881_v63 = vmul.f32 %v2170_v61, %v2154_v35  ;;  %v73_v61 = vld [vmem:[#allocation7 + $0x78] sm:$0xff] }
 0x3da   :  { %v880_v0 = vmul.f32 %v2172_v62, %v2156_v36  ;;  %v72_v62 = vld [vmem:[#allocation7 + $0x70] sm:$0xff] }
 0x3db   :  { %2074 = vmatmul.mubr.msk.f32.vlgmr.msra.gmra.mxu0 %vm190_vm2, %v881_v63  ;;  %v71_v63 = vld [vmem:[#allocation7 + $0x68] sm:$0xff] }
 0x3dc   :  { %v2174_v3 = vpop.eup %2173  ;;  %2069 = vmatmul.mubr.msk.f32.vlgmr.msra.gmra.mxu1 %vm190_vm2, %v880_v0  ;;  %2082 = vmatpush3.msra.mxu0 %v1342_v1  ;;  %v70_v0 = vld [vmem:[#allocation7 + $0x60] sm:$0xff] }
 0x3dd   :  { %v2176_v4 = vpop.eup %2175  ;;  %2077 = vmatpush3.msra.mxu1 %v1266_v48  ;;  %2078 = vmatprep.mubr.msk.f32.mxu1 %vm2281_vm1, %v2278_v7  ;;  %v883_v6 = vmul.f32 %v2174_v3, %v2158_v39 }
 0x3de   :  { %2083 = vmatprep.mubr.msk.f32.mxu0 %vm2281_vm1, %v2278_v7  ;;  %2086 = vmatprep.subr.mxu1 %v2278_v7  ;;  %v882_v8 = vmul.f32 %v2176_v4, %v2461_v40 }
 0x3df   :  { %2084 = vmatmul.mubr.msk.f32.vlgmr.msra.gmra.mxu0 %vm190_vm2, %v883_v6  ;;  %2091 = vmatprep.subr.mxu0 %v65_v18 }
 0x3e0   :  { %2079 = vmatmul.mubr.msk.f32.vlgmr.msra.gmra.mxu1 %vm190_vm2, %v882_v8  ;;  %2092 = vmatpush3.msra.mxu0 %v65_v18 }
 0x3e1   :  { %v2178_v10 = vpop.eup %2177  ;;  %2087 = vmatpush3.msra.mxu1 %v1418_v9  ;;  %2088 = vmatprep.mubr.msk.f32.mxu1 %vm2281_vm1, %v2278_v7 }
 0x3e2   :  { %v884_v11 = vmul.f32 %v2178_v10, %v2466_v43  ;;  %2093 = vmatprep.subr.mxu0 %v2502_v19 }
 0x3e3   :  { %2094 = vmatpush3.msra.mxu0 %v2502_v19 }
 0x3e4   :  { %2089 = vmatmul.mubr.msk.f32.vlgmr.msra.gmra.mxu1 %vm190_vm2, %v884_v11  ;;  %2095 = vmatprep.subr.mxu0 %v63_v20 }
 0x3e5   :  { %2096 = vmatpush3.msra.mxu0 %v63_v20 }
 0x3e6   :  { %2097 = vmatprep.subr.mxu0 %v62_v21 }
 0x3e7   :  { %2098 = vmatpush3.msra.mxu0 %v62_v21 }
 0x3e8   :  { %2113 = vmatprep.subr.mxu0 %v73_v61 }
 0x43f   :  { %v1033_v12 = vpop.f32.mrf.mxu1 }
 0x441   :  { %v2060_v13 = vpop.f32.mrf.mxu1 }
 0x443   :  { %v957_v14 = vpop.f32.mrf.mxu0 }
 0x445   :  { %v2055_v15 = vpop.f32.mrf.mxu0 }
 0x446   :  { %v1930_v15 = vld [vmem:[#allocation7 + $0x84] ss:$0 sm:$0xff] }
 0x497   :  { %v1109_v7 = vpop.f32.mrf.mxu0 }
 0x498   :  { %1495 = vrot.lane.b32.xlu0 %v1109_v7, %s2276_s18  ;;  %v1931_v7 = vld [vmem:[#allocation7 + $0x85] ss:$0 sm:$0xff] }
 0x499   :  { %v2065_v22 = vpop.f32.mrf.mxu0 }
 0x49b   :  { %v1261_v23 = vpop.f32.mrf.mxu0 }
 0x49c   :  { %v1185_v24 = vpop.f32.mrf.mxu1  ;;  %1503 = vrot.lane.b32.xlu0 %v1261_v23, %s2285_s4 }
 0x49d   :  { %1497 = vrot.lane.b32.xlu1 %v1185_v24, %s2276_s18  ;;  %v2075_v25 = vpop.f32.mrf.mxu0  ;;  %v69_v24 = vld [vmem:[#allocation7 + $0x58] sm:$0xff] }
 0x49e   :  { %v2070_v26 = vpop.f32.mrf.mxu1  ;;  %v68_v25 = vld [vmem:[#allocation7 + $0x50] sm:$0xff] }
 0x49f   :  { %v1413_v27 = vpop.f32.mrf.mxu0  ;;  %v67_v26 = vld [vmem:[#allocation7 + $0x48] sm:$0xff] }
 0x4a0   :  { %v1337_v28 = vpop.f32.mrf.mxu1  ;;  %1511 = vrot.lane.b32.xlu0 %v1413_v27, %s2286_s5  ;;  %v66_v27 = vld [vmem:[#allocation7 + $0x40] sm:$0xff] }
 0x4a1   :  { %1505 = vrot.lane.b32.xlu1 %v1337_v28, %s2285_s4  ;;  %v2085_v29 = vpop.f32.mrf.mxu0  ;;  %v1932_v28 = vld [vmem:[#allocation7 + $0x82] ss:$0 sm:$0xff] }
 0x4a2   :  { %v2080_v30 = vpop.f32.mrf.mxu1 }
 0x4a4   :  { %v1489_v31 = vpop.f32.mrf.mxu1 }
 0x4a5   :  { %1513 = vrot.lane.b32.xlu1 %v1489_v31, %s2286_s5 }
 0x4a6   :  { %v2090_v32 = vpop.f32.mrf.mxu1 }
 0x50a   :  { %v1496_v33 = vpop.permute.xlu0 %1495 }
 0x50b   :  { %v1517_v36 = vsel %vm190_vm2, %v957_v14, %v1496_v33 }
 0x50e   :  { %v1504_v34 = vpop.permute.xlu0 %1503 }
 0x50f   :  { %v1498_v35 = vpop.permute.xlu1 %1497  ;;  %v1520_v37 = vsel %vm1519_vm5, %v1517_v36, %v1504_v34 }
 0x510   :  { %v1518_v41 = vsel %vm190_vm2, %v1033_v12, %v1498_v35  ;;  %v1935_v35 = vld [vmem:[#allocation7 + $0x83] ss:$0 sm:$0xff] }
 0x512   :  { %v1512_v38 = vpop.permute.xlu0 %1511 }
 0x513   :  { %v1506_v39 = vpop.permute.xlu1 %1505  ;;  %v1523_v40 = vsel %vm1522_vm6, %v1520_v37, %v1512_v38 }
 0x514   :  { %2099 = vmatprep.mubr.msk.f32.mxu0 %vm86_vm0, %v1523_v40  ;;  %v1521_v42 = vsel %vm1519_vm5, %v1518_v41, %v1506_v39 }
 0x517   :  { %v1514_v43 = vpop.permute.xlu1 %1513 }
 0x518   :  { %v1524_v44 = vsel %vm1522_vm6, %v1521_v42, %v1514_v43 }
 0x519   :  { %2100 = vmatmul.mubr.msk.f32.vlgmr.msra.gmra.mxu0 %vm86_vm0, %v1524_v44 }
 0x51a   :  { %2114 = vmatpush3.msra.mxu0 %v73_v61 }
 0x51b   :  { %2115 = vmatprep.subr.mxu0 %v72_v62 }
 0x51c   :  { %2116 = vmatpush3.msra.mxu0 %v72_v62 }
 0x51d   :  { %2117 = vmatprep.subr.mxu0 %v71_v63 }
 0x51e   :  { %2118 = vmatpush3.msra.mxu0 %v71_v63 }
 0x51f   :  { %2119 = vmatprep.subr.mxu0 %v70_v0 }
 0x520   :  { %2120 = vmatpush3.msra.mxu0 %v70_v0 }
 0x521   :  { %2121 = vmatprep.subr.mxu0 %v69_v24 }
 0x522   :  { %2122 = vmatpush3.msra.mxu0 %v69_v24 }
 0x523   :  { %2123 = vmatprep.subr.mxu0 %v68_v25 }
 0x524   :  { %2124 = vmatpush3.msra.mxu0 %v68_v25 }
 0x525   :  { %2125 = vmatprep.subr.mxu0 %v67_v26 }
 0x526   :  { %2126 = vmatpush3.msra.mxu0 %v67_v26 }
 0x527   :  { %2127 = vmatprep.subr.mxu0 %v66_v27 }
 0x528   :  { %2128 = vmatpush3.msra.mxu0 %v66_v27 }
 0x5d9   :  { %v2101_v46 = vpop.f32.mrf.mxu0 }
 0x5da   :  { %v1607_v47 = vadd.f32 %v2101_v46, %v1927_v45 }
 0x5db   :  { %v1601_v48 = vpop.f32.mrf.mxu0 }
 0x5dc   :  { %v1602_v49 = vadd.f32 %v1927_v45, %v1601_v48  ;;  %v1611_v50 = vadd.f32 %v1607_v47, %v2330_v5 }
 0x5de   :  { %v1615_v51 = vsel %vm86_vm0, %v1611_v50, 0.0  ;;  %v1610_v52 = vadd.f32 %v1602_v49, %v2326_v2 }
 0x5df   :  { %1616 = vadd.xlane.f32.xlu1 %v1615_v51 }
 0x5e0   :  { %v1612_v53 = vsel %vm86_vm0, %v1610_v52, 0.0 }
 0x5e1   :  { %1613 = vadd.xlane.f32.xlu0 %v1612_v53 }
 0x5f0   :  { %1665 = vrot.lane.b32.xlu1 %v65_v18, %s2283_s29 }
 0x5f4   :  { %1661 = vrot.lane.b32.xlu1 %v63_v20, %s2283_s29 }
 0x5f8   :  { %1659 = vrot.lane.b32.xlu1 %v62_v21, %s2283_s29 }
 0x668   :  { %v1617_v16 = vpop.xlane.xlu1 %1616 }
 0x669   :  { %v1620_v17 = vmul.f32 0.03125, %v1617_v16 }
 0x66a   :  { %v1614_v54 = vpop.xlane.xlu0 %1613 }
 0x66b   :  { %v1622_v55 = vsub.f32 %v1611_v50, %v1620_v17  ;;  %v1619_v56 = vmul.f32 0.03125, %v1614_v54 }
 0x66c   :  { %v1666_v60 = vpop.permute.xlu1 %1665 }
 0x66d   :  { %v1621_v5 = vsub.f32 %v1610_v52, %v1619_v56  ;;  %v1624_v57 = vmul.f32 %v1622_v55, %v1622_v55  ;;  %2102 = vmatprep.subr.mxu1 %v1666_v60 }
 0x66e   :  { %2103 = vmatpush3.msra.mxu1 %v1666_v60 }
 0x66f   :  { %v1628_v58 = vsel %vm86_vm0, %v1624_v57, 0.0  ;;  %v1623_v2 = vmul.f32 %v1621_v5, %v1621_v5 }
 0x670   :  { %1629 = vadd.xlane.f32.xlu0 %v1628_v58  ;;  %v1662_v8 = vpop.permute.xlu1 %1661  ;;  %v1938_v58 = vld [vmem:[#allocation7 + $0x86] ss:$0 sm:$0xff] }
 0x671   :  { %v1625_v59 = vsel %vm86_vm0, %v1623_v2, 0.0 }
 0x674   :  { %1626 = vadd.xlane.f32.xlu0 %v1625_v59  ;;  %v1660_v12 = vpop.permute.xlu1 %1659  ;;  %v1939_v59 = vld [vmem:[#allocation7 + $0x87] ss:$0 sm:$0xff] }
 0x68a   :  { %1663 = vrot.lane.b32.xlu0 %v2502_v19, %s2283_s29 }
 0x6f9   :  { %v1630_v1 = vpop.xlane.xlu0 %1629 }
 0x6fa   :  { %v1632_v3 = vmul.f32 0.03125, %v1630_v1 }
 0x6fc   :  { %v1634_v4 = vadd.f32 1e-05, %v1632_v3 }
 0x6fd   :  { %v1627_v6 = vpop.xlane.xlu0 %1626 }
 0x6fe   :  { %2179 = vrsqrt.f32 %v1634_v4  ;;  %v1631_v9 = vmul.f32 0.03125, %v1627_v6 }
 0x700   :  { %v1633_v10 = vadd.f32 1e-05, %v1631_v9 }
 0x701   :  { %v1664_v11 = vpop.permute.xlu0 %1663 }
 0x702   :  { %2181 = vrsqrt.f32 %v1633_v10  ;;  %2104 = vmatprep.subr.mxu1 %v1664_v11 }
 0x703   :  { %2105 = vmatpush3.msra.mxu1 %v1664_v11 }
 0x704   :  { %2106 = vmatprep.subr.mxu1 %v1662_v8 }
 0x705   :  { %2107 = vmatpush3.msra.mxu1 %v1662_v8 }
 0x706   :  { %2108 = vmatprep.subr.mxu1 %v1660_v12 }
 0x707   :  { %2109 = vmatpush3.msra.mxu1 %v1660_v12 }
 0x70b   :  { %v2180_v13 = vpop.eup %2179 }
 0x70c   :  { %v1638_v14 = vmul.f32 %v2180_v13, %v1622_v55 }
 0x70e   :  { %v1644_v20 = vmul.f32 %v1930_v15, %v1638_v14 }
 0x70f   :  { %v2182_v18 = vpop.eup %2181 }
 0x710   :  { %v1637_v19 = vmul.f32 %v2182_v18, %v1621_v5  ;;  %v1650_v23 = vadd.f32 %v1931_v7, %v1644_v20 }
 0x712   :  { %v1643_v21 = vmul.f32 %v1930_v15, %v1637_v19 }
 0x714   :  { %v1649_v22 = vadd.f32 %v1931_v7, %v1643_v21 }
 0x716   :  { %2110 = vmatprep.mubr.msk.f32.mxu1 %vm86_vm0, %v1649_v22 }
 0x717   :  { %2111 = vmatmul.mubr.msk.f32.vlgmr.msra.gmra.mxu1 %vm86_vm0, %v1650_v23 }
 0x7d7   :  { %v2112_v29 = vpop.f32.mrf.mxu1 }
 0x7d8   :  { %v1749_v30 = vadd.f32 %v2112_v29, %v1932_v28 }
 0x7d9   :  { %v1743_v31 = vpop.f32.mrf.mxu1 }
 0x7da   :  { %v1744_v32 = vadd.f32 %v1932_v28, %v1743_v31  ;;  %v1753_v34 = vmax.f32 %v1749_v30, 0.0 }
 0x7dc   :  { %v1752_v33 = vmax.f32 %v1744_v32, 0.0 }
 0x7de   :  { %2129 = vmatprep.mubr.msk.f32.mxu0 %vm1758_vm7, %v1752_v33 }
 0x7df   :  { %2130 = vmatmul.mubr.msk.f32.vlgmr.msra.gmra.mxu0 %vm1758_vm7, %v1753_v34 }
 0x89f   :  { %v2131_v36 = vpop.f32.mrf.mxu0 }
 0x8a0   :  { %v1837_v37 = vadd.f32 %v2131_v36, %v1935_v35 }
 0x8a1   :  { %v1831_v38 = vpop.f32.mrf.mxu0 }
 0x8a2   :  { %v1832_v39 = vadd.f32 %v1935_v35, %v1831_v38  ;;  %v1841_v40 = vadd.f32 %v1837_v37, %v1650_v23 }
 0x8a4   :  { %v1845_v41 = vsel %vm86_vm0, %v1841_v40, 0.0  ;;  %v1840_v42 = vadd.f32 %v1832_v39, %v1649_v22 }
 0x8a5   :  { %1846 = vadd.xlane.f32.xlu1 %v1845_v41 }
 0x8a6   :  { %v1842_v43 = vsel %vm86_vm0, %v1840_v42, 0.0 }
 0x8a7   :  { %1843 = vadd.xlane.f32.xlu0 %v1842_v43 }
 0x92e   :  { %v1847_v44 = vpop.xlane.xlu1 %1846 }
 0x92f   :  { %v1849_v45 = vmul.f32 0.03125, %v1847_v44 }
 0x930   :  { %v1844_v46 = vpop.xlane.xlu0 %1843 }
 0x931   :  { %v1848_v47 = vmul.f32 0.03125, %v1844_v46  ;;  %v1851_v48 = vsub.f32 %v1841_v40, %v1849_v45 }
 0x933   :  { %v1850_v49 = vsub.f32 %v1840_v42, %v1848_v47  ;;  %v1853_v52 = vmul.f32 %v1851_v48, %v1851_v48 }
 0x935   :  { %v1852_v50 = vmul.f32 %v1850_v49, %v1850_v49  ;;  %v1857_v53 = vsel %vm86_vm0, %v1853_v52, 0.0 }
 0x937   :  { %v1854_v51 = vsel %vm86_vm0, %v1852_v50, 0.0 }
 0x938   :  { %1855 = vadd.xlane.f32.xlu0 %v1854_v51 }
 0x93c   :  { %1858 = vadd.xlane.f32.xlu0 %v1857_v53 }
 0x9c1   :  { %v1856_v16 = vpop.xlane.xlu0 %1855 }
 0x9c2   :  { %v1860_v17 = vmul.f32 0.03125, %v1856_v16 }
 0x9c4   :  { %v1862_v54 = vadd.f32 1e-05, %v1860_v17 }
 0x9c5   :  { %v1859_v55 = vpop.xlane.xlu0 %1858 }
 0x9c6   :  { %2183 = vrsqrt.f32 %v1862_v54  ;;  %v1861_v56 = vmul.f32 0.03125, %v1859_v55 }
 0x9c8   :  { %v1863_v5 = vadd.f32 1e-05, %v1861_v56 }
 0x9ca   :  { %2185 = vrsqrt.f32 %v1863_v5 }
 0x9d3   :  { %v2184_v57 = vpop.eup %2183 }
 0x9d4   :  { %v1866_v2 = vmul.f32 %v2184_v57, %v1850_v49 }
 0x9d6   :  { %v1872_v60 = vmul.f32 %v1938_v58, %v1866_v2 }
 0x9d7   :  { %v2186_v61 = vpop.eup %2185 }
 0x9d8   :  { %v1867_v62 = vmul.f32 %v2186_v61, %v1851_v48  ;;  %v1878_v63 = vadd.f32 %v1939_v59, %v1872_v60 }
 0x9da   :  { %v1873_v0 = vmul.f32 %v1938_v58, %v1867_v62  ;;  %1880 = vst.msk [vmem:[#allocation8] sm:$0xff] %vm86_vm0, %v1878_v63 }
 0x9dc   :  { %v1879_v1 = vadd.f32 %v1939_v59, %v1873_v0 }
 0x9de   :  { %1881 = vst.msk [vmem:[#allocation8 + $0x8] sm:$0xff] %vm86_vm0, %v1879_v1 }
 0x9df   :  { %2258 = shalt.err (!%p2255_p5)
}
 0x9e0   :  { %1893 = dma.vmem_to_hbm [thread:$0]  %s1888_s7, 256, %s2540_s3, [#allocation4], %s2275_s17, %s2275_s17, %s2276_s18  }
 0x9e1   :  { %2271 = dma.done.wait [#allocation4], 256  }
 0x9e2   :  { %2272 = vsyncadd [#allocation4], 4294967040 }
 0x9e3   :  { %1897 = vsyncpa [#allocation3], 1 }
 0x9e4   :  { %1898 = vsyncpa [#allocation6], 1 }
 0x9e5   :  { %1899 = vsyncpa [#allocation4], 1 }

</bundles_post_ra>
